<compile_context>
chip_gen: v6e
topology: v6e:2x2x1
jax: 0.10.0
libtpu: 0.0.40
codegen_flags: <defaults>
</compile_context>

<pallas_src>
import functools

import jax
import jax.numpy as jnp
from jax.experimental import pallas as pl
from jax.experimental.pallas import tpu as pltpu

_LANES = 128


def _aabb_collider_kernel(aabb_ref, rays_ref, near_ref, far_ref, *, near_plane):
    # aabb_ref: SMEM (6,)  [xmin, ymin, zmin, xmax, ymax, zmax]
    # rays_ref: VMEM (6, TR, 128) — [ox, oy, oz, dx, dy, dz], lane-dense rays
    # near_ref, far_ref: VMEM (TR, 128) float32
    ox = rays_ref[0]          # (TR, 128)
    oy = rays_ref[1]
    oz = rays_ref[2]
    dx = rays_ref[3]
    dy = rays_ref[4]
    dz = rays_ref[5]

    # dir_fraction = 1 / (rays_d + 1e-6)   (exact divide to match reference)
    fx = 1.0 / (dx + 1e-6)
    fy = 1.0 / (dy + 1e-6)
    fz = 1.0 / (dz + 1e-6)

    t1 = (aabb_ref[0] - ox) * fx
    t2 = (aabb_ref[3] - ox) * fx
    t3 = (aabb_ref[1] - oy) * fy
    t4 = (aabb_ref[4] - oy) * fy
    t5 = (aabb_ref[2] - oz) * fz
    t6 = (aabb_ref[5] - oz) * fz

    near = jnp.maximum(jnp.maximum(jnp.minimum(t1, t2), jnp.minimum(t3, t4)),
                       jnp.minimum(t5, t6))
    far = jnp.minimum(jnp.minimum(jnp.maximum(t1, t2), jnp.maximum(t3, t4)),
                      jnp.maximum(t5, t6))

    near = jnp.maximum(near, jnp.float32(near_plane))  # torch.clamp(min=near_plane)
    mask = near < far
    near_ref[...] = jnp.where(mask, near, 0.0)
    far_ref[...] = jnp.where(mask, far, 0.0)


def aabb_box_collider(origins, directions, scene_bbox, *, near_plane,
                      max_tile_rows=512):
    """JAX/Pallas equivalent of AABBBoxCollider.forward.

    Args:
      origins:    (N, 3) float32 ray origins
      directions: (N, 3) float32 ray directions
      scene_bbox: (6,)   float32 [min xyz, max xyz]
      near_plane: python float
    Returns:
      nears: (N, 1) float32
      fars:  (N, 1) float32
      mask:  (N,)   bool
    """
    origins = origins.astype(jnp.float32)
    directions = directions.astype(jnp.float32)
    scene_bbox = scene_bbox.astype(jnp.float32)

    n = origins.shape[0]
    rows = pl.cdiv(n, _LANES)
    # Tile rows: multiple of 8 (sublane), capped so blocks stay small in VMEM.
    tr = min(max_tile_rows, ((rows + 7) // 8) * 8)
    rows_pad = pl.cdiv(rows, tr) * tr
    n_pad = rows_pad * _LANES
    pad = n_pad - n

    # Single concat + pad + transpose pass into SoA, then view as
    # (6, rows_pad, 128) so the ray index is lane-dense and the row index is
    # sublane-dense.  Padded rays compute finite garbage that is sliced off.
    rays = jnp.concatenate([origins, directions], axis=1)          # (N, 6)
    rays = jnp.pad(rays, ((0, pad), (0, 0)))                       # (n_pad, 6)
    rays = rays.T.reshape(6, rows_pad, _LANES)                     # (6, rows, 128)

    grid = (rows_pad // tr,)
    kernel = functools.partial(_aabb_collider_kernel,
                               near_plane=float(near_plane))

    near, far = pl.pallas_call(
        kernel,
        out_shape=(
            jax.ShapeDtypeStruct((rows_pad, _LANES), jnp.float32),
            jax.ShapeDtypeStruct((rows_pad, _LANES), jnp.float32),
        ),
        grid_spec=pltpu.PrefetchScalarGridSpec(
            num_scalar_prefetch=0,
            grid=grid,
            in_specs=[
                pl.BlockSpec(memory_space=pltpu.MemorySpace.SMEM),   # aabb (6,)
                pl.BlockSpec((6, tr, _LANES), lambda i: (0, i, 0)),  # rays SoA
            ],
            out_specs=[
                pl.BlockSpec((tr, _LANES), lambda i: (i, 0)),
                pl.BlockSpec((tr, _LANES), lambda i: (i, 0)),
            ],
        ),
        compiler_params=pltpu.CompilerParams(
            dimension_semantics=("parallel",)),
    )(scene_bbox, rays)

    near = near.reshape(n_pad)[:n]
    far = far.reshape(n_pad)[:n]
    # Exact mask reconstruction: invalid rays are (0, 0); valid rays have
    # near < far, so they can never both be exactly 0 (works for any near_plane).
    mask = (near != 0.0) | (far != 0.0)
    return near[:, None], far[:, None], mask


def _reference(origins, directions, aabb, near_plane):
    """Pure-JAX reference matching the PyTorch module exactly."""
    frac = 1.0 / (directions + 1e-6)
    t1 = (aabb[0] - origins[:, 0:1]) * frac[:, 0:1]
    t2 = (aabb[3] - origins[:, 0:1]) * frac[:, 0:1]
    t3 = (aabb[1] - origins[:, 1:2]) * frac[:, 1:2]
    t4 = (aabb[4] - origins[:, 1:2]) * frac[:, 1:2]
    t5 = (aabb[2] - origins[:, 2:3]) * frac[:, 2:3]
    t6 = (aabb[5] - origins[:, 2:3]) * frac[:, 2:3]
    near = jnp.max(jnp.concatenate(
        [jnp.minimum(t1, t2), jnp.minimum(t3, t4), jnp.minimum(t5, t6)],
        axis=1), axis=1)
    far = jnp.min(jnp.concatenate(
        [jnp.maximum(t1, t2), jnp.maximum(t3, t4), jnp.maximum(t5, t6)],
        axis=1), axis=1)
    near = jnp.maximum(near, near_plane)
    mask = near < far
    near = jnp.where(mask, near, 0.0)
    far = jnp.where(mask, far, 0.0)
    return near[:, None], far[:, None], mask


if __name__ == "__main__":
    key = jax.random.PRNGKey(0)
    k1, k2 = jax.random.split(key)

    num_rays = 300          # small, non-multiple of 128 to exercise padding
    near_plane = 0.05

    # Ray origins around the box, directions roughly random (normalized).
    origins = jax.random.uniform(k1, (num_rays, 3), jnp.float32, -2.0, 2.0)
    directions = jax.random.normal(k2, (num_rays, 3), jnp.float32)
    directions = directions / jnp.linalg.norm(directions, axis=-1, keepdims=True)

    # scene_bbox: [min x,y,z, max x,y,z]
    scene_bbox = jnp.array([-1.0, -1.0, -1.0, 1.0, 1.0, 1.0], dtype=jnp.float32)

    near, far, mask = aabb_box_collider(origins, directions, scene_bbox,
                                        near_plane=near_plane)
    jax.block_until_ready((near, far, mask))

    near_ref, far_ref, mask_ref = _reference(origins, directions, scene_bbox,
                                             near_plane)
    assert near.shape == (num_rays, 1)
    assert far.shape == (num_rays, 1)
    assert mask.shape == (num_rays,)
    assert jnp.allclose(near, near_ref, atol=1e-5, rtol=1e-5)
    assert jnp.allclose(far, far_ref, atol=1e-5, rtol=1e-5)
    assert bool(jnp.all(mask == mask_ref))

    print("KERNEL_OK")
</pallas_src>

<mosaic_0001>
module attributes {stable_mosaic.version = 11 : i64} {
  func.func @_aabb_collider_kernel(%arg0: i32, %arg1: memref<6xf32, #tpu.memory_space<smem>>, %arg2: memref<6x8x128xf32, #tpu.memory_space<vmem>>, %arg3: memref<8x128xf32, #tpu.memory_space<vmem>>, %arg4: memref<8x128xf32, #tpu.memory_space<vmem>>) attributes {dimension_semantics = [#tpu.dimension_semantics<parallel>], iteration_bounds = array<i64: 1>, scalar_prefetch = 0 : i64, scratch_operands = 0 : i64, tpu.core_type = #tpu.core_type<tc>, window_params = [{transform_indices = @transform_0, window_bounds = array<i64: 6>}, {transform_indices = @transform_1, window_bounds = array<i64: 6, 8, 128>}, {transform_indices = @transform_2, window_bounds = array<i64: 8, 128>}, {transform_indices = @transform_3, window_bounds = array<i64: 8, 128>}]} {
    %c0 = arith.constant 0 : index
    %c0_0 = arith.constant 0 : index
    %c0_1 = arith.constant 0 : index
    %0 = vector.load %arg2[%c0, %c0_0, %c0_1] : memref<6x8x128xf32, #tpu.memory_space<vmem>>, vector<1x8x128xf32>
    %1 = vector.shape_cast %0 : vector<1x8x128xf32> to vector<8x128xf32>
    %c1 = arith.constant 1 : index
    %c0_2 = arith.constant 0 : index
    %c0_3 = arith.constant 0 : index
    %2 = vector.load %arg2[%c1, %c0_2, %c0_3] : memref<6x8x128xf32, #tpu.memory_space<vmem>>, vector<1x8x128xf32>
    %3 = vector.shape_cast %2 : vector<1x8x128xf32> to vector<8x128xf32>
    %c2 = arith.constant 2 : index
    %c0_4 = arith.constant 0 : index
    %c0_5 = arith.constant 0 : index
    %4 = vector.load %arg2[%c2, %c0_4, %c0_5] : memref<6x8x128xf32, #tpu.memory_space<vmem>>, vector<1x8x128xf32>
    %5 = vector.shape_cast %4 : vector<1x8x128xf32> to vector<8x128xf32>
    %c3 = arith.constant 3 : index
    %c0_6 = arith.constant 0 : index
    %c0_7 = arith.constant 0 : index
    %6 = vector.load %arg2[%c3, %c0_6, %c0_7] : memref<6x8x128xf32, #tpu.memory_space<vmem>>, vector<1x8x128xf32>
    %7 = vector.shape_cast %6 : vector<1x8x128xf32> to vector<8x128xf32>
    %c4 = arith.constant 4 : index
    %c0_8 = arith.constant 0 : index
    %c0_9 = arith.constant 0 : index
    %8 = vector.load %arg2[%c4, %c0_8, %c0_9] : memref<6x8x128xf32, #tpu.memory_space<vmem>>, vector<1x8x128xf32>
    %9 = vector.shape_cast %8 : vector<1x8x128xf32> to vector<8x128xf32>
    %c5 = arith.constant 5 : index
    %c0_10 = arith.constant 0 : index
    %c0_11 = arith.constant 0 : index
    %10 = vector.load %arg2[%c5, %c0_10, %c0_11] : memref<6x8x128xf32, #tpu.memory_space<vmem>>, vector<1x8x128xf32>
    %11 = vector.shape_cast %10 : vector<1x8x128xf32> to vector<8x128xf32>
    %cst = arith.constant 9.99999997E-7 : f32
    %12 = vector.broadcast %cst : f32 to vector<8x128xf32>
    %13 = arith.addf %7, %12 : vector<8x128xf32>
    %cst_12 = arith.constant 1.000000e+00 : f32
    %14 = vector.broadcast %cst_12 : f32 to vector<8x128xf32>
    %15 = arith.divf %14, %13 : vector<8x128xf32>
    %cst_13 = arith.constant 9.99999997E-7 : f32
    %16 = vector.broadcast %cst_13 : f32 to vector<8x128xf32>
    %17 = arith.addf %9, %16 : vector<8x128xf32>
    %cst_14 = arith.constant 1.000000e+00 : f32
    %18 = vector.broadcast %cst_14 : f32 to vector<8x128xf32>
    %19 = arith.divf %18, %17 : vector<8x128xf32>
    %cst_15 = arith.constant 9.99999997E-7 : f32
    %20 = vector.broadcast %cst_15 : f32 to vector<8x128xf32>
    %21 = arith.addf %11, %20 : vector<8x128xf32>
    %cst_16 = arith.constant 1.000000e+00 : f32
    %22 = vector.broadcast %cst_16 : f32 to vector<8x128xf32>
    %23 = arith.divf %22, %21 : vector<8x128xf32>
    %c0_17 = arith.constant 0 : index
    %24 = memref.load %arg1[%c0_17] : memref<6xf32, #tpu.memory_space<smem>>
    %25 = vector.broadcast %24 : f32 to vector<8x128xf32>
    %26 = arith.subf %25, %1 : vector<8x128xf32>
    %27 = arith.mulf %26, %15 : vector<8x128xf32>
    %c3_18 = arith.constant 3 : index
    %28 = memref.load %arg1[%c3_18] : memref<6xf32, #tpu.memory_space<smem>>
    %29 = vector.broadcast %28 : f32 to vector<8x128xf32>
    %30 = arith.subf %29, %1 : vector<8x128xf32>
    %31 = arith.mulf %30, %15 : vector<8x128xf32>
    %c1_19 = arith.constant 1 : index
    %32 = memref.load %arg1[%c1_19] : memref<6xf32, #tpu.memory_space<smem>>
    %33 = vector.broadcast %32 : f32 to vector<8x128xf32>
    %34 = arith.subf %33, %3 : vector<8x128xf32>
    %35 = arith.mulf %34, %19 : vector<8x128xf32>
    %c4_20 = arith.constant 4 : index
    %36 = memref.load %arg1[%c4_20] : memref<6xf32, #tpu.memory_space<smem>>
    %37 = vector.broadcast %36 : f32 to vector<8x128xf32>
    %38 = arith.subf %37, %3 : vector<8x128xf32>
    %39 = arith.mulf %38, %19 : vector<8x128xf32>
    %c2_21 = arith.constant 2 : index
    %40 = memref.load %arg1[%c2_21] : memref<6xf32, #tpu.memory_space<smem>>
    %41 = vector.broadcast %40 : f32 to vector<8x128xf32>
    %42 = arith.subf %41, %5 : vector<8x128xf32>
    %43 = arith.mulf %42, %23 : vector<8x128xf32>
    %c5_22 = arith.constant 5 : index
    %44 = memref.load %arg1[%c5_22] : memref<6xf32, #tpu.memory_space<smem>>
    %45 = vector.broadcast %44 : f32 to vector<8x128xf32>
    %46 = arith.subf %45, %5 : vector<8x128xf32>
    %47 = arith.mulf %46, %23 : vector<8x128xf32>
    %48 = arith.minimumf %27, %31 : vector<8x128xf32>
    %49 = arith.minimumf %35, %39 : vector<8x128xf32>
    %50 = arith.maximumf %48, %49 : vector<8x128xf32>
    %51 = arith.minimumf %43, %47 : vector<8x128xf32>
    %52 = arith.maximumf %50, %51 : vector<8x128xf32>
    %53 = arith.maximumf %27, %31 : vector<8x128xf32>
    %54 = arith.maximumf %35, %39 : vector<8x128xf32>
    %55 = arith.minimumf %53, %54 : vector<8x128xf32>
    %56 = arith.maximumf %43, %47 : vector<8x128xf32>
    %57 = arith.minimumf %55, %56 : vector<8x128xf32>
    %cst_23 = arith.constant 5.000000e-02 : f32
    %58 = vector.broadcast %cst_23 : f32 to vector<8x128xf32>
    %59 = arith.maximumf %52, %58 : vector<8x128xf32>
    %60 = arith.cmpf olt, %59, %57 : vector<8x128xf32>
    %cst_24 = arith.constant 0.000000e+00 : f32
    %61 = vector.broadcast %cst_24 : f32 to vector<8x128xf32>
    %62 = arith.select %60, %59, %61 : vector<8x128xi1>, vector<8x128xf32>
    %c0_25 = arith.constant 0 : index
    %c0_26 = arith.constant 0 : index
    %63 = vector.load %arg3[%c0_25, %c0_26] : memref<8x128xf32, #tpu.memory_space<vmem>>, vector<8x128xf32>
    tpu.vector_store %arg3[%c0_25, %c0_26], %62 {strides = array<i32>} : memref<8x128xf32, #tpu.memory_space<vmem>>, vector<8x128xf32>,
    %cst_27 = arith.constant 0.000000e+00 : f32
    %64 = vector.broadcast %cst_27 : f32 to vector<8x128xf32>
    %65 = arith.select %60, %57, %64 : vector<8x128xi1>, vector<8x128xf32>
    %c0_28 = arith.constant 0 : index
    %c0_29 = arith.constant 0 : index
    %66 = vector.load %arg4[%c0_28, %c0_29] : memref<8x128xf32, #tpu.memory_space<vmem>>, vector<8x128xf32>
    tpu.vector_store %arg4[%c0_28, %c0_29], %65 {strides = array<i32>} : memref<8x128xf32, #tpu.memory_space<vmem>>, vector<8x128xf32>,
    return
  }
  func.func @transform_0(%arg0: i32) -> i32 {
    %c0_i32 = arith.constant 0 : i32
    %c0_i32_0 = arith.constant 0 : i32
    return %c0_i32 : i32
  }
  func.func @transform_1(%arg0: i32) -> (i32, i32, i32) {
    %c0_i32 = arith.constant 0 : i32
    %c0_i32_0 = arith.constant 0 : i32
    %c0_i32_1 = arith.constant 0 : i32
    return %c0_i32, %arg0, %c0_i32_0 : i32, i32, i32
  }
  func.func @transform_2(%arg0: i32) -> (i32, i32) {
    %c0_i32 = arith.constant 0 : i32
    %c0_i32_0 = arith.constant 0 : i32
    return %arg0, %c0_i32 : i32, i32
  }
  func.func @transform_3(%arg0: i32) -> (i32, i32) {
    %c0_i32 = arith.constant 0 : i32
    %c0_i32_0 = arith.constant 0 : i32
    return %arg0, %c0_i32 : i32, i32
  }
}

</mosaic_0001>

<bundles_post_ra>
// kernel: tpu_custom_call.1
= control target key start
LH: loop header
LB: loop body
LE: loop exit
PB: predicated region body
PF: predicated region fallthrough
CT: control target
= control target key end

     0   :  { %9 = vsyncpa [#allocation5], 0  ;;  %s261_s0 = inlined_call_operand.hbm [shape: f32[6], index: 0, kind: input, shape index: {}]   ;;  %s262_s1 = inlined_call_operand.hbm [shape: f32[6,8,128], index: 1, kind: input, shape index: {}]   ;;  %s263_s2 = inlined_call_operand.hbm [shape: f32[8,128], index: 2, kind: output, shape index: {0}]   ;;  %s264_s3 = inlined_call_operand.hbm [shape: f32[8,128], index: 3, kind: output, shape index: {1}]  }
   0x1   :  { %10 = vsyncpa [#allocation3], 0 }
   0x2   :  { %11 = vsyncpa [#allocation4], 0 }
   0x3   :  { %12 = vsyncpa [#allocation9], 0  ;;  %s223_s12 = smov [#allocation2]   ;;  %s224_s15 = smov [#allocation6]  }
   0x4   :  { %20 = dma.hbm_to_smem %s261_s0, 16, %s223_s12, [#allocation5]  }
   0x5   :  { %s26_s16 = sshll.u32 %s224_s15, 4  ;;  %s27_s16 = int_to_ptr.vmem [resolvable:$true] %s26_s16 }
   0x6   :  { %s163_s17 = scalar_lea.vmem %s27_s16, 768  ;;  %p168_p1 = scmp.lt.s32.totalorder %s27_s16, %s27_s16 }
   0x7   :  { %p164_p0 = scmp.ne.s32.totalorder %s27_s16, %s163_s17  ;;  %p169_p2 = scmp.lt.s32.totalorder %s163_s17, %s163_s17 }
   0x9   :  { %p170_p3 = por %p169_p2, %p168_p1 }
   0xb   :  { %p171_p4 = pnand %p170_p3, %p164_p0 }
   0xd   :  { %174 = shalt.err (!%p171_p4)
}
   0xe   :  { %s225_s18 = smov 128   ;;  %s226_s19 = smov 8  }
   0xf   :  { %32 = dma.hbm_to_vmem [thread:$0]  %s262_s1, 768, %s27_s16, [#allocation3], %s225_s18, %s225_s18, %s226_s19  }
  0x10   :  { %215 = dma.done.wait [#allocation5], 16  }
  0x11   :  { %216 = vsyncadd [#allocation5], 4294967280 }
  0x12   :  { %217 = dma.done.wait [#allocation3], 768  }
  0x13   :  { %218 = vsyncadd [#allocation3], 4294966528 }
  0x14   :  { %39 = sfence }
  0x15   :  { %s60_s0 = sld [smem:[#allocation2]]  ;;  %v46_v0 = vld [vmem:[#allocation6 + $0x18] sm:$0xff]  ;;  %v48_v1 = vld [vmem:[#allocation6 + $0x20] sm:$0xff]  ;;  %v50_v2 = vld [vmem:[#allocation6 + $0x28] sm:$0xff]  ;;  %s227_s26 = smov [#allocation7]  }
  0x16   :  { %s130_s22 = sld [smem:[#allocation2 + $0x3]]  ;;  %v51_v3 = vadd.f32 1e-06, %v46_v0  ;;  %v54_v4 = vadd.f32 1e-06, %v48_v1  ;;  %v40_v6 = vld [vmem:[#allocation6] sm:$0xff] }
  0x17   :  { %v57_v5 = vadd.f32 1e-06, %v50_v2  ;;  %s131_s23 = sld [smem:[#allocation2 + $0x1]]  ;;  %v42_v9 = vld [vmem:[#allocation6 + $0x8] sm:$0xff]  ;;  %v44_v12 = vld [vmem:[#allocation6 + $0x10] sm:$0xff]  ;;  %s106_s27 = sshll.u32 %s227_s26, 4  ;;  %s107_s27 = int_to_ptr.vmem [resolvable:$true] %s106_s27 }
  0x18   :  { %141 = vrcp.f32 %v51_v3  ;;  %s132_s24 = sld [smem:[#allocation2 + $0x4]]  ;;  %s228_s28 = smov [#allocation8]  }
  0x19   :  { %143 = vrcp.f32 %v54_v4  ;;  %s133_s25 = sld [smem:[#allocation2 + $0x2]]  ;;  %s116_s29 = sshll.u32 %s228_s28, 4  ;;  %s117_s29 = int_to_ptr.vmem [resolvable:$true] %s116_s29 }
  0x1a   :  { %145 = vrcp.f32 %v57_v5  ;;  %s134_s1 = sld [smem:[#allocation2 + $0x5]]  ;;  %s175_s30 = scalar_lea.vmem %s107_s27, 128 }
  0x1b   :  { %v61_v7 = vstv %s60_s0  ;;  %p176_p5 = scmp.ne.s32.totalorder %s107_s27, %s175_s30  ;;  %p180_p6 = scmp.lt.s32.totalorder %s107_s27, %s107_s27 }
  0x1c   :  { %v65_v8 = vstv %s130_s22  ;;  %v62_v15 = vsub.f32 %v61_v7, %v40_v6  ;;  %p181_p7 = scmp.lt.s32.totalorder %s175_s30, %s175_s30 }
  0x1d   :  { %v69_v10 = vstv %s131_s23  ;;  %v66_v16 = vsub.f32 %v65_v8, %v40_v6 }
  0x1e   :  { %v73_v11 = vstv %s132_s24  ;;  %v70_v17 = vsub.f32 %v69_v10, %v42_v9  ;;  %p182_p8 = por %p181_p7, %p180_p6 }
  0x1f   :  { %v77_v13 = vstv %s133_s25  ;;  %v74_v18 = vsub.f32 %v73_v11, %v42_v9 }
  0x20   :  { %v81_v14 = vstv %s134_s1  ;;  %v78_v19 = vsub.f32 %v77_v13, %v44_v12  ;;  %p183_p9 = pnand %p182_p8, %p176_p5 }
  0x21   :  { %v82_v20 = vsub.f32 %v81_v14, %v44_v12 }
  0x25   :  { %v142_v21 = vpop.eup %141 }
  0x26   :  { %v144_v22 = vpop.eup %143  ;;  %v63_v23 = vmul.f32 %v142_v21, %v62_v15  ;;  %v67_v24 = vmul.f32 %v142_v21, %v66_v16 }
  0x27   :  { %v146_v25 = vpop.eup %145  ;;  %v71_v26 = vmul.f32 %v144_v22, %v70_v17  ;;  %v75_v27 = vmul.f32 %v144_v22, %v74_v18 }
  0x28   :  { %v79_v28 = vmul.f32 %v146_v25, %v78_v19  ;;  %v83_v29 = vmul.f32 %v146_v25, %v82_v20  ;;  %v84_v30 = vmin.f32 %v63_v23, %v67_v24  ;;  %v89_v31 = vmax.f32 %v63_v23, %v67_v24 }
  0x29   :  { %v85_v32 = vmin.f32 %v71_v26, %v75_v27  ;;  %v90_v33 = vmax.f32 %v71_v26, %v75_v27 }
  0x2a   :  { %v87_v34 = vmin.f32 %v79_v28, %v83_v29  ;;  %v92_v35 = vmax.f32 %v79_v28, %v83_v29 }
  0x2b   :  { %v86_v36 = vmax.f32 %v84_v30, %v85_v32  ;;  %v91_v37 = vmin.f32 %v89_v31, %v90_v33 }
  0x2d   :  { %v88_v38 = vmax.f32 %v86_v36, %v87_v34  ;;  %v93_v39 = vmin.f32 %v91_v37, %v92_v35 }
  0x2f   :  { %v94_v40 = vmax.f32 %v88_v38, 0.05 }
  0x31   :  { %vm95_vm0 = vcmp.lt.f32.partialorder %v94_v40, %v93_v39 }
  0x32   :  { %v96_v41 = vsel %vm95_vm0, %v94_v40, 0.0  ;;  %v98_v42 = vsel %vm95_vm0, %v93_v39, 0.0 }
  0x33   :  { %97 = vst [vmem:[#allocation7] sm:$0xff] %v96_v41  ;;  %99 = vst [vmem:[#allocation8] sm:$0xff] %v98_v42 }
  0x34   :  { %186 = shalt.err (!%p183_p9)
}
  0x35   :  { %109 = dma.vmem_to_hbm [thread:$0]  %s107_s27, 128, %s263_s2, [#allocation4]  }
  0x36   :  { %s195_s6 = scalar_lea.vmem %s117_s29, 128  ;;  %p200_p11 = scmp.lt.s32.totalorder %s117_s29, %s117_s29 }
  0x37   :  { %p196_p10 = scmp.ne.s32.totalorder %s117_s29, %s195_s6  ;;  %p201_p12 = scmp.lt.s32.totalorder %s195_s6, %s195_s6 }
  0x39   :  { %p202_p13 = por %p201_p12, %p200_p11 }
  0x3b   :  { %p203_p0 = pnand %p202_p13, %p196_p10 }
  0x3d   :  { %206 = shalt.err (!%p203_p0)
}
  0x3e   :  { %119 = dma.vmem_to_hbm [thread:$0]  %s117_s29, 128, %s264_s3, [#allocation9]  }
  0x3f   :  { %219 = dma.done.wait [#allocation4], 128  }
  0x40   :  { %220 = vsyncadd [#allocation4], 4294967168 }
  0x41   :  { %221 = dma.done.wait [#allocation9], 128  }
  0x42   :  { %222 = vsyncadd [#allocation9], 4294967168 }
  0x43   :  { %126 = vsyncpa [#allocation3], 1 }
  0x44   :  { %127 = vsyncpa [#allocation4], 1 }
  0x45   :  { %128 = vsyncpa [#allocation9], 1 }
  0x46   :  { %129 = vsyncpa [#allocation5], 1 }

</bundles_post_ra>
